<compile_context>
chip_gen: v7x
topology: tpu7x:2x2x1
jax: 0.10.0
libtpu: 0.0.40
codegen_flags: <defaults>
</compile_context>

<pallas_src>
import jax
import jax.numpy as jnp
from jax.experimental import pallas as pl
from jax.experimental.pallas import tpu as pltpu

CIN, COUT, KH, KW = 3, 128, 3, 3
K_REAL = KH * KW * CIN        # 27
K_PAD = 32                    # pad contraction dim to 32 (not 128) per review
TILE_M_MAX = 4096             # output-pixel rows per grid step (~2 MiB f32 out block)


def _round_up(x, m):
    return (x + m - 1) // m * m


def _gemm_bias_kernel(p_ref, w_ref, b_ref, o_ref):
    """o = p @ w + b   (single-shot K on the MXU, f32 accumulation).

    p_ref: (TILE_M, K_PAD)   im2col patches        (VMEM)
    w_ref: (K_PAD, COUT)     reshaped conv weight  (VMEM, resident across grid)
    b_ref: (1, COUT)         bias                  (VMEM, resident across grid)
    o_ref: (TILE_M, COUT)    lane-dense output tile
    """
    acc = jnp.dot(p_ref[...], w_ref[...], preferred_element_type=jnp.float32)
    o_ref[...] = (acc + b_ref[...].astype(jnp.float32)).astype(o_ref.dtype)


def conv_mid_forward(x_nchw, w_oihw, bias, *, compute_dtype=None):
    """Matches torch: y = Conv2d(3, 128, kernel_size=3, stride=1)(x); NCHW in/out.

    compute_dtype: optionally jnp.bfloat16 for the MXU inputs (halves patch/weight
    HBM traffic; accumulation stays f32). Default keeps the input dtype.
    """
    n, cin, h, w = x_nchw.shape
    assert cin == CIN
    ho, wo = h - KH + 1, w - KW + 1
    m = n * ho * wo

    in_dtype = x_nchw.dtype
    cdtype = in_dtype if compute_dtype is None else compute_dtype

    # ---- im2col pre-pass (cheap XLA work on the 3-channel input) ------------
    x_nhwc = jnp.transpose(x_nchw, (0, 2, 3, 1))                 # (N, H, W, Cin)
    taps = [x_nhwc[:, dy:dy + ho, dx:dx + wo, :]
            for dy in range(KH) for dx in range(KW)]
    patches = jnp.concatenate(taps, axis=-1)                     # (N, Ho, Wo, 27)
    patches = patches.reshape(m, K_REAL).astype(cdtype)

    # Weight OIHW -> HWIO -> (27, Cout); K ordering (dy, dx, c) matches patches.
    w_mat = jnp.transpose(w_oihw, (2, 3, 1, 0)).reshape(K_REAL, COUT).astype(cdtype)

    # Pad K to 32 and M up to a multiple of the row tile (zero rows are sliced off).
    tile_m = min(TILE_M_MAX, _round_up(m, 8))
    m_pad = _round_up(m, tile_m)
    patches = jnp.pad(patches, ((0, m_pad - m), (0, K_PAD - K_REAL)))
    w_mat = jnp.pad(w_mat, ((0, K_PAD - K_REAL), (0, 0)))
    b_mat = bias.reshape(1, COUT).astype(jnp.float32)

    out_flat = pl.pallas_call(
        _gemm_bias_kernel,
        out_shape=jax.ShapeDtypeStruct((m_pad, COUT), in_dtype),
        grid=(m_pad // tile_m,),
        in_specs=[
            pl.BlockSpec((tile_m, K_PAD), lambda i: (i, 0)),     # patches: M-tiled
            pl.BlockSpec((K_PAD, COUT), lambda i: (0, 0)),       # weight: resident
            pl.BlockSpec((1, COUT), lambda i: (0, 0)),           # bias: resident
        ],
        out_specs=pl.BlockSpec((tile_m, COUT), lambda i: (i, 0)),  # lane-dense (128)
        compiler_params=pltpu.CompilerParams(
            dimension_semantics=("parallel",),                   # v7x megacore sharding
            vmem_limit_bytes=32 * 1024 * 1024,                   # bounded for v7x
        ),
    )(patches, w_mat, b_mat)

    out_nhwc = out_flat[:m].reshape(n, ho, wo, COUT)
    # NOTE: if the downstream consumer accepts NHWC, return out_nhwc directly and
    # skip this transpose (it re-reads/re-writes the full output in HBM). Kept
    # here to preserve the PyTorch module's NCHW output contract.
    return jnp.transpose(out_nhwc, (0, 3, 1, 2))                 # (N, Cout, Ho, Wo)


if __name__ == "__main__":
    key = jax.random.PRNGKey(0)
    kx, kw, kb = jax.random.split(key, 3)

    # Deterministic synthetic params, PyTorch shapes: weight OIHW, bias (Cout,)
    fan_in = CIN * KH * KW
    bound = 1.0 / (fan_in ** 0.5)
    w_oihw = jax.random.uniform(kw, (COUT, CIN, KH, KW), jnp.float32, -bound, bound)
    bias = jax.random.uniform(kb, (COUT,), jnp.float32, -bound, bound)

    # Input: NCHW, small shape consistent with Conv2d(3, 128, 3)
    x = jax.random.normal(kx, (2, CIN, 16, 16), jnp.float32)

    y = jax.jit(conv_mid_forward)(x, w_oihw, bias)
    y = jax.block_until_ready(y)
    assert y.shape == (2, COUT, 14, 14), y.shape

    # Sanity check against XLA's conv (same semantics as torch Conv2d, VALID pad).
    y_ref = jax.lax.conv_general_dilated(
        x, w_oihw, window_strides=(1, 1), padding="VALID",
        dimension_numbers=("NCHW", "OIHW", "NCHW"),
    ) + bias[None, :, None, None]
    # Tolerance covers MXU / XLA-conv f32 precision-path differences (bf16 passes).
    assert jnp.allclose(y, y_ref, atol=2e-2, rtol=2e-2), \
        float(jnp.max(jnp.abs(y - y_ref)))

    print("KERNEL_OK")
</pallas_src>

<mosaic_0001>
module attributes {stable_mosaic.version = 11 : i64} {
  func.func @_gemm_bias_kernel(%arg0: i32, %arg1: memref<392x32xf32, #tpu.memory_space<vmem>>, %arg2: memref<32x128xf32, #tpu.memory_space<vmem>>, %arg3: memref<1x128xf32, #tpu.memory_space<vmem>>, %arg4: memref<392x128xf32, #tpu.memory_space<vmem>>) attributes {dimension_semantics = [#tpu.dimension_semantics<parallel>], iteration_bounds = array<i64: 1>, scalar_prefetch = 0 : i64, scratch_operands = 0 : i64, tpu.core_type = #tpu.core_type<tc>, window_params = [{transform_indices = @transform_0, window_bounds = array<i64: 392, 32>}, {pipeline_mode = #tpu.pipeline_mode<synchronous>, transform_indices = @transform_1, window_bounds = array<i64: 32, 128>}, {pipeline_mode = #tpu.pipeline_mode<synchronous>, transform_indices = @transform_2, window_bounds = array<i64: 1, 128>}, {transform_indices = @transform_3, window_bounds = array<i64: 392, 128>}]} {
    %c0 = arith.constant 0 : index
    %c0_0 = arith.constant 0 : index
    %0 = vector.load %arg1[%c0, %c0_0] : memref<392x32xf32, #tpu.memory_space<vmem>>, vector<392x32xf32>
    %c0_1 = arith.constant 0 : index
    %c0_2 = arith.constant 0 : index
    %1 = vector.load %arg2[%c0_1, %c0_2] : memref<32x128xf32, #tpu.memory_space<vmem>>, vector<32x128xf32>
    %cst = arith.constant dense<0.000000e+00> : vector<392x128xf32>
    %2 = tpu.matmul %0, %1, %cst {dimension_numbers = #tpu.dot_dimension_numbers<[1], [0], [0], [1], [0, 0, 1, 1], [], []>} : vector<392x32xf32>, vector<32x128xf32>, vector<392x128xf32> -> vector<392x128xf32>
    %c0_3 = arith.constant 0 : index
    %c0_4 = arith.constant 0 : index
    %3 = vector.load %arg3[%c0_3, %c0_4] : memref<1x128xf32, #tpu.memory_space<vmem>>, vector<1x128xf32>
    %4 = vector.broadcast %3 : vector<1x128xf32> to vector<392x128xf32>
    %5 = arith.addf %2, %4 : vector<392x128xf32>
    %c0_5 = arith.constant 0 : index
    %c0_6 = arith.constant 0 : index
    %6 = vector.load %arg4[%c0_5, %c0_6] : memref<392x128xf32, #tpu.memory_space<vmem>>, vector<392x128xf32>
    tpu.vector_store %arg4[%c0_5, %c0_6], %5 {strides = array<i32>} : memref<392x128xf32, #tpu.memory_space<vmem>>, vector<392x128xf32>,
    return
  }
  func.func @transform_0(%arg0: i32) -> (i32, i32) {
    %c0_i32 = arith.constant 0 : i32
    %c0_i32_0 = arith.constant 0 : i32
    return %arg0, %c0_i32 : i32, i32
  }
  func.func @transform_1(%arg0: i32) -> (i32, i32) {
    %c0_i32 = arith.constant 0 : i32
    %c0_i32_0 = arith.constant 0 : i32
    %c0_i32_1 = arith.constant 0 : i32
    return %c0_i32, %c0_i32_0 : i32, i32
  }
  func.func @transform_2(%arg0: i32) -> (i32, i32) {
    %c0_i32 = arith.constant 0 : i32
    %c0_i32_0 = arith.constant 0 : i32
    %c0_i32_1 = arith.constant 0 : i32
    return %c0_i32, %c0_i32_0 : i32, i32
  }
  func.func @transform_3(%arg0: i32) -> (i32, i32) {
    %c0_i32 = arith.constant 0 : i32
    %c0_i32_0 = arith.constant 0 : i32
    return %arg0, %c0_i32 : i32, i32
  }
}

</mosaic_0001>

<bundles_post_ra>
// kernel: conv_mid_forward.1
= control target key start
LH: loop header
LB: loop body
LE: loop exit
PB: predicated region body
PF: predicated region fallthrough
CT: control target
= control target key end

     0   :  { %v856_v0 = vmov 0.0|0.0   ;;  %vm857_vm0 = vmmov 0   ;;  %v858_v6 = vmov 0.0   ;;  %vm74_vm1 = vcmask 261120   ;;  %s1386_s1 = inlined_call_operand.vmem [shape: f32[32,128], index: 1, kind: input, shape index: {}]   ;;  %s1387_s0 = inlined_call_operand.vmem [shape: f32[392,32], index: 0, kind: input, shape index: {}]   ;;  %s1388_s2 = inlined_call_operand.vmem [shape: f32[1,128], index: 2, kind: input, shape index: {}]   ;;  %s1389_s3 = inlined_call_operand.vmem [shape: f32[392,128], index: 3, kind: output, shape index: {}]  }
   0x1   :  { %843 = vmatprep.subr.bf16.mxu0 %v856_v0  ;;  %v63_v1 = vld [vmem:[%s1386_s1] sm:$0xff]  ;;  %v64_v2 = vld [vmem:[%s1386_s1 + $0x8] sm:$0xff]  ;;  %849 = vmatprep.subr.bf16.mxu1 %v856_v0  ;;  %v65_v3 = vld [vmem:[%s1386_s1 + $0x10] sm:$0xff] }
   0x2   :  { %v844_v4 = vpack.c.bf16 %v64_v2, %v63_v1  ;;  %v66_v5 = vld [vmem:[%s1386_s1 + $0x18] sm:$0xff]  ;;  %696 = vmatprep.mubr.msk.f32.mxu0 %vm857_vm0, %v858_v6  ;;  %771 = vmatprep.mubr.msk.f32.mxu1 %vm857_vm0, %v858_v6  ;;  %v14_v8 = vld [vmem:[%s1387_s0] sm:$0xff]  ;;  %v39_v9 = vld [vmem:[%s1387_s0 + $0xc8] sm:$0xff] }
   0x3   :  { %v847_v7 = vpack.c.bf16 %v66_v5, %v65_v3  ;;  %v15_v10 = vld [vmem:[%s1387_s0 + $0x8] sm:$0xff]  ;;  %v40_v11 = vld [vmem:[%s1387_s0 + $0xd0] sm:$0xff]  ;;  %v41_v13 = vld [vmem:[%s1387_s0 + $0xd8] sm:$0xff] }
   0x4   :  { %845 = vmatpush3.bf16.msra.mxu0 %v844_v4  ;;  %851 = vmatpush3.bf16.msra.mxu1 %v844_v4  ;;  %v16_v12 = vld [vmem:[%s1387_s0 + $0x10] sm:$0xff]  ;;  %v17_v14 = vld [vmem:[%s1387_s0 + $0x18] sm:$0xff]  ;;  %v42_v15 = vld [vmem:[%s1387_s0 + $0xe0] sm:$0xff] }
   0x5   :  { %846 = vmatprep.subr.bf16.mxu0 %v856_v0  ;;  %850 = vmatprep.subr.bf16.mxu1 %v856_v0  ;;  %v18_v16 = vld [vmem:[%s1387_s0 + $0x20] sm:$0xff]  ;;  %v43_v17 = vld [vmem:[%s1387_s0 + $0xe8] sm:$0xff]  ;;  %v44_v19 = vld [vmem:[%s1387_s0 + $0xf0] sm:$0xff] }
   0x6   :  { %v19_v18 = vld [vmem:[%s1387_s0 + $0x28] sm:$0xff]  ;;  %v20_v20 = vld [vmem:[%s1387_s0 + $0x30] sm:$0xff]  ;;  %v45_v21 = vld [vmem:[%s1387_s0 + $0xf8] sm:$0xff] }
   0x7   :  { %v21_v22 = vld [vmem:[%s1387_s0 + $0x38] sm:$0xff]  ;;  %v46_v23 = vld [vmem:[%s1387_s0 + $0x100] sm:$0xff]  ;;  %v47_v25 = vld [vmem:[%s1387_s0 + $0x108] sm:$0xff] }
   0x8   :  { %848 = vmatpush3.bf16.msra.mxu0 %v847_v7  ;;  %852 = vmatpush3.bf16.msra.mxu1 %v847_v7  ;;  %v22_v24 = vld [vmem:[%s1387_s0 + $0x40] sm:$0xff]  ;;  %v23_v26 = vld [vmem:[%s1387_s0 + $0x48] sm:$0xff]  ;;  %v48_v27 = vld [vmem:[%s1387_s0 + $0x110] sm:$0xff] }
   0x9   :  { %v24_v28 = vld [vmem:[%s1387_s0 + $0x50] sm:$0xff]  ;;  %v49_v29 = vld [vmem:[%s1387_s0 + $0x118] sm:$0xff]  ;;  %v50_v31 = vld [vmem:[%s1387_s0 + $0x120] sm:$0xff] }
   0xa   :  { %v25_v30 = vld [vmem:[%s1387_s0 + $0x58] sm:$0xff]  ;;  %v26_v32 = vld [vmem:[%s1387_s0 + $0x60] sm:$0xff]  ;;  %v51_v33 = vld [vmem:[%s1387_s0 + $0x128] sm:$0xff] }
   0xb   :  { %697 = vmatmul.mubr.msk.f32.vlgmr.msra.gmra.mrb[0].mxu0 %vm74_vm1, %v14_v8  ;;  %772 = vmatmul.mubr.msk.f32.vlgmr.msra.gmra.mrb[0].mxu1 %vm74_vm1, %v39_v9  ;;  %v27_v34 = vld [vmem:[%s1387_s0 + $0x68] sm:$0xff]  ;;  %v52_v35 = vld [vmem:[%s1387_s0 + $0x130] sm:$0xff]  ;;  %v53_v37 = vld [vmem:[%s1387_s0 + $0x138] sm:$0xff] }
   0xc   :  { %699 = vmatprep.mubr.msk.f32.mxu0 %vm857_vm0, %v858_v6  ;;  %774 = vmatprep.mubr.msk.f32.mxu1 %vm857_vm0, %v858_v6  ;;  %v28_v36 = vld [vmem:[%s1387_s0 + $0x70] sm:$0xff]  ;;  %v29_v38 = vld [vmem:[%s1387_s0 + $0x78] sm:$0xff]  ;;  %v54_v39 = vld [vmem:[%s1387_s0 + $0x140] sm:$0xff] }
   0xd   :  { %v30_v40 = vld [vmem:[%s1387_s0 + $0x80] sm:$0xff]  ;;  %v55_v41 = vld [vmem:[%s1387_s0 + $0x148] sm:$0xff]  ;;  %v56_v43 = vld [vmem:[%s1387_s0 + $0x150] sm:$0xff] }
   0xe   :  { %v31_v42 = vld [vmem:[%s1387_s0 + $0x88] sm:$0xff]  ;;  %v32_v44 = vld [vmem:[%s1387_s0 + $0x90] sm:$0xff]  ;;  %v57_v45 = vld [vmem:[%s1387_s0 + $0x158] sm:$0xff] }
   0xf   :  { %700 = vmatmul.mubr.msk.f32.gmra.mrb[2].mxu0 %vm74_vm1, %v15_v10  ;;  %775 = vmatmul.mubr.msk.f32.gmra.mrb[2].mxu1 %vm74_vm1, %v40_v11  ;;  %v33_v46 = vld [vmem:[%s1387_s0 + $0x98] sm:$0xff]  ;;  %v58_v47 = vld [vmem:[%s1387_s0 + $0x160] sm:$0xff]  ;;  %v59_v49 = vld [vmem:[%s1387_s0 + $0x168] sm:$0xff] }
  0x10   :  { %702 = vmatprep.mubr.msk.f32.mxu0 %vm857_vm0, %v858_v6  ;;  %777 = vmatprep.mubr.msk.f32.mxu1 %vm857_vm0, %v858_v6  ;;  %v34_v48 = vld [vmem:[%s1387_s0 + $0xa0] sm:$0xff]  ;;  %v35_v50 = vld [vmem:[%s1387_s0 + $0xa8] sm:$0xff]  ;;  %v60_v51 = vld [vmem:[%s1387_s0 + $0x170] sm:$0xff] }
  0x11   :  { %v36_v52 = vld [vmem:[%s1387_s0 + $0xb0] sm:$0xff]  ;;  %v61_v53 = vld [vmem:[%s1387_s0 + $0x178] sm:$0xff]  ;;  %v62_v55 = vld [vmem:[%s1387_s0 + $0x180] sm:$0xff] }
  0x12   :  { %v37_v54 = vld [vmem:[%s1387_s0 + $0xb8] sm:$0xff]  ;;  %v38_v56 = vld [vmem:[%s1387_s0 + $0xc0] sm:$0xff] }
  0x13   :  { %703 = vmatmul.mubr.msk.f32.gmra.mrb[4].mxu0 %vm74_vm1, %v16_v12  ;;  %778 = vmatmul.mubr.msk.f32.gmra.mrb[4].mxu1 %vm74_vm1, %v41_v13  ;;  %v1188_v57 = vld [vmem:[%s1388_s2] ss:$0 sm:$0xff] }
  0x14   :  { %705 = vmatprep.mubr.msk.f32.mxu0 %vm857_vm0, %v858_v6  ;;  %780 = vmatprep.mubr.msk.f32.mxu1 %vm857_vm0, %v858_v6 }
  0x17   :  { %706 = vmatmul.mubr.msk.f32.gmra.mrb[6].mxu0 %vm74_vm1, %v17_v14  ;;  %781 = vmatmul.mubr.msk.f32.gmra.mrb[6].mxu1 %vm74_vm1, %v42_v15 }
  0x18   :  { %708 = vmatprep.mubr.msk.f32.mxu0 %vm857_vm0, %v858_v6  ;;  %783 = vmatprep.mubr.msk.f32.mxu1 %vm857_vm0, %v858_v6 }
  0x1b   :  { %709 = vmatmul.mubr.msk.f32.gmra.mrb[8].mxu0 %vm74_vm1, %v18_v16  ;;  %784 = vmatmul.mubr.msk.f32.gmra.mrb[8].mxu1 %vm74_vm1, %v43_v17 }
  0x1c   :  { %711 = vmatprep.mubr.msk.f32.mxu0 %vm857_vm0, %v858_v6  ;;  %786 = vmatprep.mubr.msk.f32.mxu1 %vm857_vm0, %v858_v6 }
  0x1f   :  { %712 = vmatmul.mubr.msk.f32.gmra.mrb[10].mxu0 %vm74_vm1, %v19_v18  ;;  %787 = vmatmul.mubr.msk.f32.gmra.mrb[10].mxu1 %vm74_vm1, %v44_v19 }
  0x20   :  { %714 = vmatprep.mubr.msk.f32.mxu0 %vm857_vm0, %v858_v6  ;;  %789 = vmatprep.mubr.msk.f32.mxu1 %vm857_vm0, %v858_v6 }
  0x23   :  { %715 = vmatmul.mubr.msk.f32.gmra.mrb[12].mxu0 %vm74_vm1, %v20_v20  ;;  %790 = vmatmul.mubr.msk.f32.gmra.mrb[12].mxu1 %vm74_vm1, %v45_v21 }
  0x24   :  { %717 = vmatprep.mubr.msk.f32.mxu0 %vm857_vm0, %v858_v6  ;;  %792 = vmatprep.mubr.msk.f32.mxu1 %vm857_vm0, %v858_v6 }
  0x27   :  { %718 = vmatmul.mubr.msk.f32.gmra.mrb[14].mxu0 %vm74_vm1, %v21_v22  ;;  %793 = vmatmul.mubr.msk.f32.gmra.mrb[14].mxu1 %vm74_vm1, %v46_v23 }
  0x28   :  { %720 = vmatprep.mubr.msk.f32.mxu0 %vm857_vm0, %v858_v6  ;;  %795 = vmatprep.mubr.msk.f32.mxu1 %vm857_vm0, %v858_v6 }
  0x2b   :  { %721 = vmatmul.mubr.msk.f32.gmra.mrb[16].mxu0 %vm74_vm1, %v22_v24  ;;  %796 = vmatmul.mubr.msk.f32.gmra.mrb[16].mxu1 %vm74_vm1, %v47_v25 }
  0x2c   :  { %723 = vmatprep.mubr.msk.f32.mxu0 %vm857_vm0, %v858_v6  ;;  %798 = vmatprep.mubr.msk.f32.mxu1 %vm857_vm0, %v858_v6 }
  0x2f   :  { %724 = vmatmul.mubr.msk.f32.gmra.mrb[18].mxu0 %vm74_vm1, %v23_v26  ;;  %799 = vmatmul.mubr.msk.f32.gmra.mrb[18].mxu1 %vm74_vm1, %v48_v27 }
  0x30   :  { %726 = vmatprep.mubr.msk.f32.mxu0 %vm857_vm0, %v858_v6  ;;  %801 = vmatprep.mubr.msk.f32.mxu1 %vm857_vm0, %v858_v6 }
  0x33   :  { %727 = vmatmul.mubr.msk.f32.gmra.mrb[20].mxu0 %vm74_vm1, %v24_v28  ;;  %802 = vmatmul.mubr.msk.f32.gmra.mrb[20].mxu1 %vm74_vm1, %v49_v29 }
  0x34   :  { %729 = vmatprep.mubr.msk.f32.mxu0 %vm857_vm0, %v858_v6  ;;  %804 = vmatprep.mubr.msk.f32.mxu1 %vm857_vm0, %v858_v6 }
  0x37   :  { %730 = vmatmul.mubr.msk.f32.gmra.mrb[22].mxu0 %vm74_vm1, %v25_v30  ;;  %805 = vmatmul.mubr.msk.f32.gmra.mrb[22].mxu1 %vm74_vm1, %v50_v31 }
  0x38   :  { %732 = vmatprep.mubr.msk.f32.mxu0 %vm857_vm0, %v858_v6  ;;  %807 = vmatprep.mubr.msk.f32.mxu1 %vm857_vm0, %v858_v6 }
  0x3b   :  { %733 = vmatmul.mubr.msk.f32.gmra.mrb[24].mxu0 %vm74_vm1, %v26_v32  ;;  %808 = vmatmul.mubr.msk.f32.gmra.mrb[24].mxu1 %vm74_vm1, %v51_v33 }
  0x3c   :  { %735 = vmatprep.mubr.msk.f32.mxu0 %vm857_vm0, %v858_v6  ;;  %810 = vmatprep.mubr.msk.f32.mxu1 %vm857_vm0, %v858_v6 }
  0x3f   :  { %736 = vmatmul.mubr.msk.f32.gmra.mrb[26].mxu0 %vm74_vm1, %v27_v34  ;;  %811 = vmatmul.mubr.msk.f32.gmra.mrb[26].mxu1 %vm74_vm1, %v52_v35 }
  0x40   :  { %738 = vmatprep.mubr.msk.f32.mxu0 %vm857_vm0, %v858_v6  ;;  %813 = vmatprep.mubr.msk.f32.mxu1 %vm857_vm0, %v858_v6 }
  0x43   :  { %739 = vmatmul.mubr.msk.f32.gmra.mrb[28].mxu0 %vm74_vm1, %v28_v36  ;;  %814 = vmatmul.mubr.msk.f32.gmra.mrb[28].mxu1 %vm74_vm1, %v53_v37 }
  0x44   :  { %741 = vmatprep.mubr.msk.f32.mxu0 %vm857_vm0, %v858_v6  ;;  %816 = vmatprep.mubr.msk.f32.mxu1 %vm857_vm0, %v858_v6 }
  0x47   :  { %742 = vmatmul.mubr.msk.f32.gmra.mrb[30].mxu0 %vm74_vm1, %v29_v38  ;;  %817 = vmatmul.mubr.msk.f32.gmra.mrb[30].mxu1 %vm74_vm1, %v54_v39 }
  0x48   :  { %744 = vmatprep.mubr.msk.f32.mxu0 %vm857_vm0, %v858_v6  ;;  %819 = vmatprep.mubr.msk.f32.mxu1 %vm857_vm0, %v858_v6 }
  0x4b   :  { %745 = vmatmul.mubr.msk.f32.gmra.mrb[32].mxu0 %vm74_vm1, %v30_v40  ;;  %820 = vmatmul.mubr.msk.f32.gmra.mrb[32].mxu1 %vm74_vm1, %v55_v41 }
  0x4c   :  { %747 = vmatprep.mubr.msk.f32.mxu0 %vm857_vm0, %v858_v6  ;;  %822 = vmatprep.mubr.msk.f32.mxu1 %vm857_vm0, %v858_v6 }
  0x4f   :  { %748 = vmatmul.mubr.msk.f32.gmra.mrb[34].mxu0 %vm74_vm1, %v31_v42  ;;  %823 = vmatmul.mubr.msk.f32.gmra.mrb[34].mxu1 %vm74_vm1, %v56_v43 }
  0x50   :  { %750 = vmatprep.mubr.msk.f32.mxu0 %vm857_vm0, %v858_v6  ;;  %825 = vmatprep.mubr.msk.f32.mxu1 %vm857_vm0, %v858_v6 }
  0x53   :  { %751 = vmatmul.mubr.msk.f32.gmra.mrb[36].mxu0 %vm74_vm1, %v32_v44  ;;  %826 = vmatmul.mubr.msk.f32.gmra.mrb[36].mxu1 %vm74_vm1, %v57_v45 }
  0x54   :  { %753 = vmatprep.mubr.msk.f32.mxu0 %vm857_vm0, %v858_v6  ;;  %828 = vmatprep.mubr.msk.f32.mxu1 %vm857_vm0, %v858_v6 }
  0x57   :  { %754 = vmatmul.mubr.msk.f32.gmra.mrb[38].mxu0 %vm74_vm1, %v33_v46  ;;  %829 = vmatmul.mubr.msk.f32.gmra.mrb[38].mxu1 %vm74_vm1, %v58_v47 }
  0x58   :  { %756 = vmatprep.mubr.msk.f32.mxu0 %vm857_vm0, %v858_v6  ;;  %831 = vmatprep.mubr.msk.f32.mxu1 %vm857_vm0, %v858_v6 }
  0x5b   :  { %757 = vmatmul.mubr.msk.f32.gmra.mrb[40].mxu0 %vm74_vm1, %v34_v48  ;;  %832 = vmatmul.mubr.msk.f32.gmra.mrb[40].mxu1 %vm74_vm1, %v59_v49 }
  0x5c   :  { %759 = vmatprep.mubr.msk.f32.mxu0 %vm857_vm0, %v858_v6  ;;  %834 = vmatprep.mubr.msk.f32.mxu1 %vm857_vm0, %v858_v6 }
  0x5f   :  { %760 = vmatmul.mubr.msk.f32.gmra.mrb[42].mxu0 %vm74_vm1, %v35_v50  ;;  %835 = vmatmul.mubr.msk.f32.gmra.mrb[42].mxu1 %vm74_vm1, %v60_v51 }
  0x60   :  { %762 = vmatprep.mubr.msk.f32.mxu0 %vm857_vm0, %v858_v6  ;;  %837 = vmatprep.mubr.msk.f32.mxu1 %vm857_vm0, %v858_v6 }
  0x63   :  { %763 = vmatmul.mubr.msk.f32.gmra.mrb[44].mxu0 %vm74_vm1, %v36_v52  ;;  %838 = vmatmul.mubr.msk.f32.gmra.mrb[44].mxu1 %vm74_vm1, %v61_v53 }
  0x64   :  { %765 = vmatprep.mubr.msk.f32.mxu0 %vm857_vm0, %v858_v6  ;;  %840 = vmatprep.mubr.msk.f32.mxu1 %vm857_vm0, %v858_v6 }
  0x67   :  { %766 = vmatmul.mubr.msk.f32.gmra.mrb[46].mxu0 %vm74_vm1, %v37_v54  ;;  %841 = vmatmul.mubr.msk.f32.gmra.mrb[46].mxu1 %vm74_vm1, %v62_v55 }
  0x68   :  { %768 = vmatprep.mubr.msk.f32.mxu0 %vm857_vm0, %v858_v6 }
  0x6b   :  { %769 = vmatmul.mubr.msk.f32.gmra.mrb[48].mxu0 %vm74_vm1, %v38_v56 }
  0xde   :  { %v288_v58 = vpop.f32.mrb[0].mxu0  ;;  %v413_v59 = vpop.f32.mrb[0].mxu1 }
  0xdf   :  { %v289_v60 = vadd.f32 %v1188_v57, %v288_v58  ;;  %v698_v61 = vpop.f32.mrb[1].mxu0  ;;  %v414_v62 = vadd.f32 %v1188_v57, %v413_v59  ;;  %v773_v63 = vpop.f32.mrb[1].mxu1 }
  0xe1   :  { %532 = vst [vmem:[%s1389_s3] sm:$0xff] %v289_v60  ;;  %557 = vst [vmem:[%s1389_s3 + $0xc8] sm:$0xff] %v414_v62 }
  0xe2   :  { %v293_v0 = vpop.f32.mrb[2].mxu0  ;;  %v418_v1 = vpop.f32.mrb[2].mxu1 }
  0xe3   :  { %v294_v2 = vadd.f32 %v1188_v57, %v293_v0  ;;  %v701_v3 = vpop.f32.mrb[3].mxu0  ;;  %v419_v4 = vadd.f32 %v1188_v57, %v418_v1  ;;  %v776_v5 = vpop.f32.mrb[3].mxu1 }
  0xe5   :  { %533 = vst [vmem:[%s1389_s3 + $0x8] sm:$0xff] %v294_v2  ;;  %558 = vst [vmem:[%s1389_s3 + $0xd0] sm:$0xff] %v419_v4 }
  0xe6   :  { %v298_v6 = vpop.f32.mrb[4].mxu0  ;;  %v423_v7 = vpop.f32.mrb[4].mxu1 }
  0xe7   :  { %v299_v8 = vadd.f32 %v1188_v57, %v298_v6  ;;  %v704_v9 = vpop.f32.mrb[5].mxu0  ;;  %v424_v10 = vadd.f32 %v1188_v57, %v423_v7  ;;  %v779_v11 = vpop.f32.mrb[5].mxu1 }
  0xe9   :  { %534 = vst [vmem:[%s1389_s3 + $0x10] sm:$0xff] %v299_v8  ;;  %559 = vst [vmem:[%s1389_s3 + $0xd8] sm:$0xff] %v424_v10 }
  0xea   :  { %v303_v12 = vpop.f32.mrb[6].mxu0  ;;  %v428_v13 = vpop.f32.mrb[6].mxu1 }
  0xeb   :  { %v304_v14 = vadd.f32 %v1188_v57, %v303_v12  ;;  %v707_v15 = vpop.f32.mrb[7].mxu0  ;;  %v429_v16 = vadd.f32 %v1188_v57, %v428_v13  ;;  %v782_v17 = vpop.f32.mrb[7].mxu1 }
  0xed   :  { %535 = vst [vmem:[%s1389_s3 + $0x18] sm:$0xff] %v304_v14  ;;  %560 = vst [vmem:[%s1389_s3 + $0xe0] sm:$0xff] %v429_v16 }
  0xee   :  { %v308_v18 = vpop.f32.mrb[8].mxu0  ;;  %v433_v19 = vpop.f32.mrb[8].mxu1 }
  0xef   :  { %v309_v20 = vadd.f32 %v1188_v57, %v308_v18  ;;  %v710_v21 = vpop.f32.mrb[9].mxu0  ;;  %v434_v22 = vadd.f32 %v1188_v57, %v433_v19  ;;  %v785_v23 = vpop.f32.mrb[9].mxu1 }
  0xf1   :  { %536 = vst [vmem:[%s1389_s3 + $0x20] sm:$0xff] %v309_v20  ;;  %561 = vst [vmem:[%s1389_s3 + $0xe8] sm:$0xff] %v434_v22 }
  0xf2   :  { %v313_v24 = vpop.f32.mrb[10].mxu0  ;;  %v438_v25 = vpop.f32.mrb[10].mxu1 }
  0xf3   :  { %v314_v26 = vadd.f32 %v1188_v57, %v313_v24  ;;  %v713_v27 = vpop.f32.mrb[11].mxu0  ;;  %v439_v28 = vadd.f32 %v1188_v57, %v438_v25  ;;  %v788_v29 = vpop.f32.mrb[11].mxu1 }
  0xf5   :  { %537 = vst [vmem:[%s1389_s3 + $0x28] sm:$0xff] %v314_v26  ;;  %562 = vst [vmem:[%s1389_s3 + $0xf0] sm:$0xff] %v439_v28 }
  0xf6   :  { %v318_v30 = vpop.f32.mrb[12].mxu0  ;;  %v443_v31 = vpop.f32.mrb[12].mxu1 }
  0xf7   :  { %v319_v32 = vadd.f32 %v1188_v57, %v318_v30  ;;  %v716_v33 = vpop.f32.mrb[13].mxu0  ;;  %v444_v34 = vadd.f32 %v1188_v57, %v443_v31  ;;  %v791_v35 = vpop.f32.mrb[13].mxu1 }
  0xf9   :  { %538 = vst [vmem:[%s1389_s3 + $0x30] sm:$0xff] %v319_v32  ;;  %563 = vst [vmem:[%s1389_s3 + $0xf8] sm:$0xff] %v444_v34 }
  0xfa   :  { %v323_v36 = vpop.f32.mrb[14].mxu0  ;;  %v448_v37 = vpop.f32.mrb[14].mxu1 }
  0xfb   :  { %v324_v38 = vadd.f32 %v1188_v57, %v323_v36  ;;  %v719_v39 = vpop.f32.mrb[15].mxu0  ;;  %v449_v40 = vadd.f32 %v1188_v57, %v448_v37  ;;  %v794_v41 = vpop.f32.mrb[15].mxu1 }
  0xfd   :  { %539 = vst [vmem:[%s1389_s3 + $0x38] sm:$0xff] %v324_v38  ;;  %564 = vst [vmem:[%s1389_s3 + $0x100] sm:$0xff] %v449_v40 }
  0xfe   :  { %v328_v42 = vpop.f32.mrb[16].mxu0  ;;  %v453_v43 = vpop.f32.mrb[16].mxu1 }
  0xff   :  { %v329_v44 = vadd.f32 %v1188_v57, %v328_v42  ;;  %v722_v45 = vpop.f32.mrb[17].mxu0  ;;  %v454_v46 = vadd.f32 %v1188_v57, %v453_v43  ;;  %v797_v47 = vpop.f32.mrb[17].mxu1 }
 0x101   :  { %540 = vst [vmem:[%s1389_s3 + $0x40] sm:$0xff] %v329_v44  ;;  %565 = vst [vmem:[%s1389_s3 + $0x108] sm:$0xff] %v454_v46 }
 0x102   :  { %v333_v48 = vpop.f32.mrb[18].mxu0  ;;  %v458_v49 = vpop.f32.mrb[18].mxu1 }
 0x103   :  { %v334_v50 = vadd.f32 %v1188_v57, %v333_v48  ;;  %v725_v51 = vpop.f32.mrb[19].mxu0  ;;  %v459_v52 = vadd.f32 %v1188_v57, %v458_v49  ;;  %v800_v53 = vpop.f32.mrb[19].mxu1 }
 0x105   :  { %541 = vst [vmem:[%s1389_s3 + $0x48] sm:$0xff] %v334_v50  ;;  %566 = vst [vmem:[%s1389_s3 + $0x110] sm:$0xff] %v459_v52 }
 0x106   :  { %v338_v54 = vpop.f32.mrb[20].mxu0  ;;  %v463_v55 = vpop.f32.mrb[20].mxu1 }
 0x107   :  { %v339_v56 = vadd.f32 %v1188_v57, %v338_v54  ;;  %v728_v58 = vpop.f32.mrb[21].mxu0  ;;  %v464_v59 = vadd.f32 %v1188_v57, %v463_v55  ;;  %v803_v60 = vpop.f32.mrb[21].mxu1 }
 0x109   :  { %542 = vst [vmem:[%s1389_s3 + $0x50] sm:$0xff] %v339_v56  ;;  %567 = vst [vmem:[%s1389_s3 + $0x118] sm:$0xff] %v464_v59 }
 0x10a   :  { %v343_v61 = vpop.f32.mrb[22].mxu0  ;;  %v468_v62 = vpop.f32.mrb[22].mxu1 }
 0x10b   :  { %v344_v63 = vadd.f32 %v1188_v57, %v343_v61  ;;  %v731_v0 = vpop.f32.mrb[23].mxu0  ;;  %v469_v1 = vadd.f32 %v1188_v57, %v468_v62  ;;  %v806_v2 = vpop.f32.mrb[23].mxu1 }
 0x10d   :  { %543 = vst [vmem:[%s1389_s3 + $0x58] sm:$0xff] %v344_v63  ;;  %568 = vst [vmem:[%s1389_s3 + $0x120] sm:$0xff] %v469_v1 }
 0x10e   :  { %v348_v3 = vpop.f32.mrb[24].mxu0  ;;  %v473_v4 = vpop.f32.mrb[24].mxu1 }
 0x10f   :  { %v349_v5 = vadd.f32 %v1188_v57, %v348_v3  ;;  %v734_v6 = vpop.f32.mrb[25].mxu0  ;;  %v474_v7 = vadd.f32 %v1188_v57, %v473_v4  ;;  %v809_v8 = vpop.f32.mrb[25].mxu1 }
 0x111   :  { %544 = vst [vmem:[%s1389_s3 + $0x60] sm:$0xff] %v349_v5  ;;  %569 = vst [vmem:[%s1389_s3 + $0x128] sm:$0xff] %v474_v7 }
 0x112   :  { %v353_v9 = vpop.f32.mrb[26].mxu0  ;;  %v478_v10 = vpop.f32.mrb[26].mxu1 }
 0x113   :  { %v354_v11 = vadd.f32 %v1188_v57, %v353_v9  ;;  %v737_v12 = vpop.f32.mrb[27].mxu0  ;;  %v479_v13 = vadd.f32 %v1188_v57, %v478_v10  ;;  %v812_v14 = vpop.f32.mrb[27].mxu1 }
 0x115   :  { %545 = vst [vmem:[%s1389_s3 + $0x68] sm:$0xff] %v354_v11  ;;  %570 = vst [vmem:[%s1389_s3 + $0x130] sm:$0xff] %v479_v13 }
 0x116   :  { %v358_v15 = vpop.f32.mrb[28].mxu0  ;;  %v483_v16 = vpop.f32.mrb[28].mxu1 }
 0x117   :  { %v359_v17 = vadd.f32 %v1188_v57, %v358_v15  ;;  %v740_v18 = vpop.f32.mrb[29].mxu0  ;;  %v484_v19 = vadd.f32 %v1188_v57, %v483_v16  ;;  %v815_v20 = vpop.f32.mrb[29].mxu1 }
 0x119   :  { %546 = vst [vmem:[%s1389_s3 + $0x70] sm:$0xff] %v359_v17  ;;  %571 = vst [vmem:[%s1389_s3 + $0x138] sm:$0xff] %v484_v19 }
 0x11a   :  { %v363_v21 = vpop.f32.mrb[30].mxu0  ;;  %v488_v22 = vpop.f32.mrb[30].mxu1 }
 0x11b   :  { %v364_v23 = vadd.f32 %v1188_v57, %v363_v21  ;;  %v743_v24 = vpop.f32.mrb[31].mxu0  ;;  %v489_v25 = vadd.f32 %v1188_v57, %v488_v22  ;;  %v818_v26 = vpop.f32.mrb[31].mxu1 }
 0x11d   :  { %547 = vst [vmem:[%s1389_s3 + $0x78] sm:$0xff] %v364_v23  ;;  %572 = vst [vmem:[%s1389_s3 + $0x140] sm:$0xff] %v489_v25 }
 0x11e   :  { %v368_v27 = vpop.f32.mrb[32].mxu0  ;;  %v493_v28 = vpop.f32.mrb[32].mxu1 }
 0x11f   :  { %v369_v29 = vadd.f32 %v1188_v57, %v368_v27  ;;  %v746_v30 = vpop.f32.mrb[33].mxu0  ;;  %v494_v31 = vadd.f32 %v1188_v57, %v493_v28  ;;  %v821_v32 = vpop.f32.mrb[33].mxu1 }
 0x121   :  { %548 = vst [vmem:[%s1389_s3 + $0x80] sm:$0xff] %v369_v29  ;;  %573 = vst [vmem:[%s1389_s3 + $0x148] sm:$0xff] %v494_v31 }
 0x122   :  { %v373_v33 = vpop.f32.mrb[34].mxu0  ;;  %v498_v34 = vpop.f32.mrb[34].mxu1 }
 0x123   :  { %v374_v35 = vadd.f32 %v1188_v57, %v373_v33  ;;  %v749_v36 = vpop.f32.mrb[35].mxu0  ;;  %v499_v37 = vadd.f32 %v1188_v57, %v498_v34  ;;  %v824_v38 = vpop.f32.mrb[35].mxu1 }
 0x125   :  { %549 = vst [vmem:[%s1389_s3 + $0x88] sm:$0xff] %v374_v35  ;;  %574 = vst [vmem:[%s1389_s3 + $0x150] sm:$0xff] %v499_v37 }
 0x126   :  { %v378_v39 = vpop.f32.mrb[36].mxu0  ;;  %v503_v40 = vpop.f32.mrb[36].mxu1 }
 0x127   :  { %v379_v41 = vadd.f32 %v1188_v57, %v378_v39  ;;  %v752_v42 = vpop.f32.mrb[37].mxu0  ;;  %v504_v43 = vadd.f32 %v1188_v57, %v503_v40  ;;  %v827_v44 = vpop.f32.mrb[37].mxu1 }
 0x129   :  { %550 = vst [vmem:[%s1389_s3 + $0x90] sm:$0xff] %v379_v41  ;;  %575 = vst [vmem:[%s1389_s3 + $0x158] sm:$0xff] %v504_v43 }
 0x12a   :  { %v383_v45 = vpop.f32.mrb[38].mxu0  ;;  %v508_v46 = vpop.f32.mrb[38].mxu1 }
 0x12b   :  { %v384_v47 = vadd.f32 %v1188_v57, %v383_v45  ;;  %v755_v48 = vpop.f32.mrb[39].mxu0  ;;  %v509_v49 = vadd.f32 %v1188_v57, %v508_v46  ;;  %v830_v50 = vpop.f32.mrb[39].mxu1 }
 0x12d   :  { %551 = vst [vmem:[%s1389_s3 + $0x98] sm:$0xff] %v384_v47  ;;  %576 = vst [vmem:[%s1389_s3 + $0x160] sm:$0xff] %v509_v49 }
 0x12e   :  { %v388_v51 = vpop.f32.mrb[40].mxu0  ;;  %v513_v52 = vpop.f32.mrb[40].mxu1 }
 0x12f   :  { %v389_v53 = vadd.f32 %v1188_v57, %v388_v51  ;;  %v758_v54 = vpop.f32.mrb[41].mxu0  ;;  %v514_v55 = vadd.f32 %v1188_v57, %v513_v52  ;;  %v833_v56 = vpop.f32.mrb[41].mxu1 }
 0x131   :  { %552 = vst [vmem:[%s1389_s3 + $0xa0] sm:$0xff] %v389_v53  ;;  %577 = vst [vmem:[%s1389_s3 + $0x168] sm:$0xff] %v514_v55 }
 0x132   :  { %v393_v58 = vpop.f32.mrb[42].mxu0  ;;  %v518_v59 = vpop.f32.mrb[42].mxu1 }
 0x133   :  { %v394_v60 = vadd.f32 %v1188_v57, %v393_v58  ;;  %v761_v61 = vpop.f32.mrb[43].mxu0  ;;  %v519_v62 = vadd.f32 %v1188_v57, %v518_v59  ;;  %v836_v63 = vpop.f32.mrb[43].mxu1 }
 0x135   :  { %553 = vst [vmem:[%s1389_s3 + $0xa8] sm:$0xff] %v394_v60  ;;  %578 = vst [vmem:[%s1389_s3 + $0x170] sm:$0xff] %v519_v62 }
 0x136   :  { %v398_v0 = vpop.f32.mrb[44].mxu0  ;;  %v523_v1 = vpop.f32.mrb[44].mxu1 }
 0x137   :  { %v399_v2 = vadd.f32 %v1188_v57, %v398_v0  ;;  %v764_v3 = vpop.f32.mrb[45].mxu0  ;;  %v524_v4 = vadd.f32 %v1188_v57, %v523_v1  ;;  %v839_v5 = vpop.f32.mrb[45].mxu1 }
 0x139   :  { %554 = vst [vmem:[%s1389_s3 + $0xb0] sm:$0xff] %v399_v2  ;;  %579 = vst [vmem:[%s1389_s3 + $0x178] sm:$0xff] %v524_v4 }
 0x13a   :  { %v403_v6 = vpop.f32.mrb[46].mxu0  ;;  %v528_v7 = vpop.f32.mrb[46].mxu1 }
 0x13b   :  { %v404_v8 = vadd.f32 %v1188_v57, %v403_v6  ;;  %v767_v9 = vpop.f32.mrb[47].mxu0  ;;  %v529_v10 = vadd.f32 %v1188_v57, %v528_v7  ;;  %v842_v11 = vpop.f32.mrb[47].mxu1 }
 0x13d   :  { %555 = vst [vmem:[%s1389_s3 + $0xb8] sm:$0xff] %v404_v8  ;;  %580 = vst [vmem:[%s1389_s3 + $0x180] sm:$0xff] %v529_v10 }
 0x13e   :  { %v408_v12 = vpop.f32.mrb[48].mxu0 }
 0x13f   :  { %v409_v13 = vadd.f32 %v1188_v57, %v408_v12  ;;  %v770_v14 = vpop.f32.mrb[49].mxu0 }
 0x141   :  { %556 = vst [vmem:[%s1389_s3 + $0xc0] sm:$0xff] %v409_v13 }

</bundles_post_ra>
